<compile_context>
chip_gen: v5e
topology: v5e:2x2
jax: 0.10.0
libtpu: 0.0.40
codegen_flags: <defaults>
</compile_context>

<pallas_src>
import functools

import jax
import jax.numpy as jnp
from jax import lax
from jax.experimental import pallas as pl
from jax.experimental.pallas import tpu as pltpu


def _round_up(x, m):
    return ((x + m - 1) // m) * m


def _cond_conv_kernel(x_ref, w_ref, b_ref, o_ref, patch_ref, *,
                      bt, cin, kh, kw, dil, wp, k_valid):
    # x_ref:     (bt, Cin, Lx)      zero-padded flattened input (lane-dense)
    # w_ref:     (bt, Cout_p, K_p)  per-sample flattened conv weights
    # b_ref:     (bt, Cout_p, 1)    per-sample bias (float32)
    # o_ref:     (bt, Cout_p, Lo)   lane-dense stride-1 output slab
    # patch_ref: (K_p, Lo)          VMEM scratch: in-kernel im2col slab
    k_p, lo = patch_ref.shape

    # Zero the K-padding rows once per grid step (they multiply zero weight
    # columns but must be finite).  Done unconditionally so it also holds on
    # the second v7x core, which never sees program_id == 0.
    if k_p > k_valid:
        patch_ref[pl.ds(k_valid, k_p - k_valid), :] = jnp.zeros(
            (k_p - k_valid, lo), patch_ref.dtype)

    def body(s, carry):
        # Build the im2col slab in VMEM: the rows for tap (i, j) are the
        # flattened input shifted by (i*dil*Wp + j*dil) positions, realized as
        # a static lane-offset load from the over-padded input block (no roll,
        # no reshape; out-of-range columns read zeros).
        for i in range(kh):
            for j in range(kw):
                off = i * dil * wp + j * dil
                tap = i * kw + j
                patch_ref[pl.ds(tap * cin, cin), :] = (
                    x_ref[s, :, pl.ds(off, lo)])
        acc = jnp.dot(w_ref[s], patch_ref[...],
                      preferred_element_type=jnp.float32)
        acc = acc + b_ref[s]                 # f32 bias on the f32 accumulator
        o_ref[s] = acc.astype(o_ref.dtype)
        return carry

    lax.fori_loop(0, bt, body, 0, unroll=True)


def cond_conv2d_pallas(x, kernels, bias, *, stride=1, padding=0, dilation=1,
                       vmem_budget_bytes=24 * 1024 * 1024,
                       max_block_batch=32):
    """Per-sample conv2d: out[b] = conv2d(x[b], kernels[b]) + bias[b]."""
    B, Cin, H, W = x.shape
    _, Cout, _, KH, KW = kernels.shape
    dtype = x.dtype
    itemsize = jnp.dtype(dtype).itemsize
    sub = {4: 8, 2: 16, 1: 32}.get(itemsize, 8)     # sublane multiple

    Hp, Wp = H + 2 * padding, W + 2 * padding
    Ho = (Hp - dilation * (KH - 1) - 1) // stride + 1
    Wo = (Wp - dilation * (KW - 1) - 1) // stride + 1
    Ho1 = Hp - dilation * (KH - 1)                  # stride-1 output extents
    Wo1 = Wp - dilation * (KW - 1)

    K = Cin * KH * KW
    K_p = _round_up(K, sub)
    Cout_p = _round_up(Cout, sub)
    Lo = _round_up(Hp * Wp, 128)                    # lane-dense output width
    max_off = dilation * ((KH - 1) * Wp + (KW - 1))
    Lx = _round_up(Lo + max_off, 128)               # over-padded input width

    # Zero-padded, flattened, lane-dense input: (B, Cin, Lx).
    x_pad = jnp.pad(x, ((0, 0), (0, 0), (padding, padding),
                        (padding, padding)))
    x_flat = jnp.pad(x_pad.reshape(B, Cin, Hp * Wp),
                     ((0, 0), (0, 0), (0, Lx - Hp * Wp)))

    # Per-sample weights, flattened tap-major / channel-minor to match the
    # in-kernel patch layout: k = (i*KW + j)*Cin + c.
    w = kernels.transpose(0, 1, 3, 4, 2).reshape(B, Cout, K).astype(dtype)
    w = jnp.pad(w, ((0, 0), (0, Cout_p - Cout), (0, K_p - K)))
    b3 = jnp.pad(bias.astype(jnp.float32).reshape(B, Cout, 1),
                 ((0, 0), (0, Cout_p - Cout), (0, 0)))

    # Samples per grid step from a VMEM budget; keep >= 2 grid steps so the
    # "parallel" batch axis can be sharded across v7x's two TensorCores.
    scratch_bytes = K_p * Lo * itemsize
    per_sample = ((Cin * Lx + Cout_p * K_p + Cout_p * Lo) * itemsize
                  + Cout_p * 4)
    bt = max(1, (vmem_budget_bytes - scratch_bytes) // (2 * per_sample))
    bt = int(max(1, min(bt, max_block_batch, -(-B // 2))))
    Bp = _round_up(B, bt)
    if Bp != B:
        pad_b = ((0, Bp - B), (0, 0), (0, 0))
        x_flat = jnp.pad(x_flat, pad_b)
        w = jnp.pad(w, pad_b)
        b3 = jnp.pad(b3, pad_b)

    kern = functools.partial(_cond_conv_kernel, bt=bt, cin=Cin, kh=KH, kw=KW,
                             dil=dilation, wp=Wp, k_valid=K)

    need = 2 * bt * per_sample + scratch_bytes
    vmem_limit = int(min(48 * 2 ** 20, max(32 * 2 ** 20, 2 * need)))

    cost = pl.CostEstimate(
        flops=2 * Bp * Cout_p * K_p * Lo,
        transcendentals=0,
        bytes_accessed=(x_flat.size + w.size + Bp * Cout_p * Lo) * itemsize
        + b3.size * 4)

    out_flat = pl.pallas_call(
        kern,
        out_shape=jax.ShapeDtypeStruct((Bp, Cout_p, Lo), dtype),
        grid_spec=pltpu.PrefetchScalarGridSpec(
            num_scalar_prefetch=0,
            grid=(Bp // bt,),
            in_specs=[
                pl.BlockSpec((bt, Cin, Lx), lambda b: (b, 0, 0)),
                pl.BlockSpec((bt, Cout_p, K_p), lambda b: (b, 0, 0)),
                pl.BlockSpec((bt, Cout_p, 1), lambda b: (b, 0, 0)),
            ],
            out_specs=pl.BlockSpec((bt, Cout_p, Lo), lambda b: (b, 0, 0)),
            scratch_shapes=[pltpu.VMEM((K_p, Lo), dtype)],
        ),
        compiler_params=pltpu.CompilerParams(
            dimension_semantics=("parallel",),
            vmem_limit_bytes=vmem_limit),
        cost_estimate=cost,
    )(x_flat, w, b3)

    # Output column p corresponds to the flat padded position p = ho*Wp + wo
    # of the stride-1 conv; crop the valid region, then subsample for stride.
    out = out_flat[:B, :Cout, :Hp * Wp].reshape(B, Cout, Hp, Wp)
    out = out[:, :, :Ho1, :Wo1]
    if stride > 1:
        # TODO(synk): stride>1 reuses the stride-1 kernel and subsamples
        # (≈ stride^2 extra MXU work; kernel stays HBM-bound).
        out = out[:, :, ::stride, ::stride]
    # TODO(synk): add an L-tile grid axis (with halo) for feature maps whose
    # per-sample slab exceeds the VMEM budget even at bt=1.
    return out[:, :, :Ho, :Wo]


def _linear_params(key, in_features, out_features, with_bias=True):
    # Torch nn.Linear default init: U(-k, k), k = 1/sqrt(in_features).
    kw, kb = jax.random.split(key)
    k = 1.0 / jnp.sqrt(jnp.float32(in_features))
    w = jax.random.uniform(kw, (out_features, in_features), jnp.float32, -k, k)
    b = (jax.random.uniform(kb, (out_features,), jnp.float32, -k, k)
         if with_bias else None)
    return w, b


class LittleMoreEfficientCondConv2dPallas:
    def __init__(self, in_channels, out_channels, kernel_size, att_inchannel,
                 stride=1, num_workers=8, padding=0, dilation=1,
                 dropout_rate=0.1, bias=True, key=None):
        if num_workers < 1:
            raise ValueError("num_workers must be positive integer")
        self.in_channels = in_channels
        self.out_channels = out_channels
        self.kh, self.kw = (kernel_size, kernel_size) \
            if isinstance(kernel_size, int) else kernel_size
        self.stride = stride
        self.padding = padding
        self.dilation = dilation
        self.isbias = bias
        self.num_workers = num_workers

        if key is None:
            key = jax.random.PRNGKey(0)
        k1, k2, k3, k4, k5 = jax.random.split(key, 5)
        wdim = out_channels * in_channels * self.kh * self.kw
        self.weight_lin, _ = _linear_params(k1, num_workers, wdim, False)
        if bias:
            self.bias_lin, _ = _linear_params(k2, num_workers, out_channels,
                                              False)
        self.att1_w, self.att1_b = _linear_params(k3, att_inchannel,
                                                  in_channels)
        self.att2_w, self.att2_b = _linear_params(k4, in_channels,
                                                  in_channels)
        self.att_w, self.att_b = _linear_params(k5, in_channels, num_workers)
        # TODO(synk): dropout implemented with inference (identity) semantics;
        # training-mode stochastic dropout is not reproduced.

    def __call__(self, x, att_x, att_with_x=True):
        B = x.shape[0]
        if att_with_x:
            pooled = jnp.mean(x, axis=(2, 3))   # adaptive_avg_pool2d -> squeeze
            mix = jnp.tanh(att_x @ self.att1_w.T + self.att1_b
                           + pooled @ self.att2_w.T + self.att2_b)
        else:
            mix = jnp.tanh(att_x @ self.att1_w.T + self.att1_b)
        attention = jax.nn.softmax(mix @ self.att_w.T + self.att_b, axis=1)

        kernels = (attention @ self.weight_lin.T).reshape(
            B, self.out_channels, self.in_channels, self.kh, self.kw)
        if self.isbias:
            bias = (attention @ self.bias_lin.T).reshape(B, self.out_channels)
        else:
            bias = jnp.zeros((B, self.out_channels), jnp.float32)

        return cond_conv2d_pallas(x, kernels, bias, stride=self.stride,
                                  padding=self.padding,
                                  dilation=self.dilation)


def _reference_cond_conv(x, kernels, bias, stride, padding, dilation):
    outs = []
    for b in range(x.shape[0]):
        o = jax.lax.conv_general_dilated(
            x[b:b + 1], kernels[b],
            window_strides=(stride, stride),
            padding=[(padding, padding), (padding, padding)],
            rhs_dilation=(dilation, dilation),
            dimension_numbers=("NCHW", "OIHW", "NCHW"))
        outs.append(o[0] + bias[b][:, None, None])
    return jnp.stack(outs)


if __name__ == "__main__":
    key = jax.random.PRNGKey(0)
    k_param, k_x, k_att = jax.random.split(key, 3)

    B, Cin, Cout, H, W = 2, 4, 8, 16, 16
    att_in, workers, ksize, pad = 6, 8, 3, 1

    mod = LittleMoreEfficientCondConv2dPallas(
        in_channels=Cin, out_channels=Cout, kernel_size=ksize,
        att_inchannel=att_in, stride=1, num_workers=workers, padding=pad,
        dilation=1, bias=True, key=k_param)

    x = jax.random.normal(k_x, (B, Cin, H, W), jnp.float32)
    att_x = jax.random.normal(k_att, (B, att_in), jnp.float32)

    out = mod(x, att_x, att_with_x=True)
    out = jax.block_until_ready(out)

    # Sanity check against a plain-JAX per-sample conv reference.
    pooled = jnp.mean(x, axis=(2, 3))
    mix = jnp.tanh(att_x @ mod.att1_w.T + mod.att1_b
                   + pooled @ mod.att2_w.T + mod.att2_b)
    attention = jax.nn.softmax(mix @ mod.att_w.T + mod.att_b, axis=1)
    kernels = (attention @ mod.weight_lin.T).reshape(B, Cout, Cin, ksize,
                                                     ksize)
    bias = (attention @ mod.bias_lin.T).reshape(B, Cout)
    ref = _reference_cond_conv(x, kernels, bias, 1, pad, 1)

    assert out.shape == (B, Cout, H, W), out.shape
    assert jnp.allclose(out, ref, atol=2e-3, rtol=2e-3), \
        float(jnp.max(jnp.abs(out - ref)))

    print("KERNEL_OK")
</pallas_src>

<mosaic_0001>
module attributes {stable_mosaic.version = 11 : i64} {
  func.func @_cond_conv_kernel(%arg0: i32, %arg1: memref<1x4x512xf32, #tpu.memory_space<vmem>>, %arg2: memref<1x8x40xf32, #tpu.memory_space<vmem>>, %arg3: memref<1x8x1xf32, #tpu.memory_space<vmem>>, %arg4: memref<1x8x384xf32, #tpu.memory_space<vmem>>, %arg5: memref<40x384xf32, #tpu.memory_space<vmem>>) attributes {dimension_semantics = [#tpu.dimension_semantics<parallel>], iteration_bounds = array<i64: 2>, scalar_prefetch = 0 : i64, scratch_operands = 1 : i64, tpu.core_type = #tpu.core_type<tc>, window_params = [{transform_indices = @transform_0, window_bounds = array<i64: 1, 4, 512>}, {transform_indices = @transform_1, window_bounds = array<i64: 1, 8, 40>}, {transform_indices = @transform_2, window_bounds = array<i64: 1, 8, 1>}, {transform_indices = @transform_3, window_bounds = array<i64: 1, 8, 384>}]} {
    %cst = arith.constant 0.000000e+00 : f32
    %0 = vector.broadcast %cst : f32 to vector<4x384xf32>
    %c36 = arith.constant 36 : index
    %c0 = arith.constant 0 : index
    %1 = vector.load %arg5[%c36, %c0] : memref<40x384xf32, #tpu.memory_space<vmem>>, vector<4x384xf32>
    tpu.vector_store %arg5[%c36, %c0], %0 {strides = array<i32>} : memref<40x384xf32, #tpu.memory_space<vmem>>, vector<4x384xf32>,
    %c0_i32 = arith.constant 0 : i32
    %2 = arith.index_cast %c0_i32 : i32 to index
    %c0_0 = arith.constant 0 : index
    %c0_1 = arith.constant 0 : index
    %3 = vector.load %arg1[%2, %c0_0, %c0_1] : memref<1x4x512xf32, #tpu.memory_space<vmem>>, vector<1x4x384xf32>
    %4 = vector.shape_cast %3 : vector<1x4x384xf32> to vector<4x384xf32>
    %c0_2 = arith.constant 0 : index
    %c0_3 = arith.constant 0 : index
    %5 = vector.load %arg5[%c0_2, %c0_3] : memref<40x384xf32, #tpu.memory_space<vmem>>, vector<4x384xf32>
    tpu.vector_store %arg5[%c0_2, %c0_3], %4 {strides = array<i32>} : memref<40x384xf32, #tpu.memory_space<vmem>>, vector<4x384xf32>,
    %6 = arith.index_cast %c0_i32 : i32 to index
    %c0_4 = arith.constant 0 : index
    %c1 = arith.constant 1 : index
    %7 = vector.load %arg1[%6, %c0_4, %c1] : memref<1x4x512xf32, #tpu.memory_space<vmem>>, vector<1x4x384xf32>
    %8 = vector.shape_cast %7 : vector<1x4x384xf32> to vector<4x384xf32>
    %c4 = arith.constant 4 : index
    %c0_5 = arith.constant 0 : index
    %9 = vector.load %arg5[%c4, %c0_5] : memref<40x384xf32, #tpu.memory_space<vmem>>, vector<4x384xf32>
    tpu.vector_store %arg5[%c4, %c0_5], %8 {strides = array<i32>} : memref<40x384xf32, #tpu.memory_space<vmem>>, vector<4x384xf32>,
    %10 = arith.index_cast %c0_i32 : i32 to index
    %c0_6 = arith.constant 0 : index
    %c2 = arith.constant 2 : index
    %11 = vector.load %arg1[%10, %c0_6, %c2] : memref<1x4x512xf32, #tpu.memory_space<vmem>>, vector<1x4x384xf32>
    %12 = vector.shape_cast %11 : vector<1x4x384xf32> to vector<4x384xf32>
    %c8 = arith.constant 8 : index
    %c0_7 = arith.constant 0 : index
    %13 = vector.load %arg5[%c8, %c0_7] : memref<40x384xf32, #tpu.memory_space<vmem>>, vector<4x384xf32>
    tpu.vector_store %arg5[%c8, %c0_7], %12 {strides = array<i32>} : memref<40x384xf32, #tpu.memory_space<vmem>>, vector<4x384xf32>,
    %14 = arith.index_cast %c0_i32 : i32 to index
    %c0_8 = arith.constant 0 : index
    %c18 = arith.constant 18 : index
    %15 = vector.load %arg1[%14, %c0_8, %c18] : memref<1x4x512xf32, #tpu.memory_space<vmem>>, vector<1x4x384xf32>
    %16 = vector.shape_cast %15 : vector<1x4x384xf32> to vector<4x384xf32>
    %c12 = arith.constant 12 : index
    %c0_9 = arith.constant 0 : index
    %17 = vector.load %arg5[%c12, %c0_9] : memref<40x384xf32, #tpu.memory_space<vmem>>, vector<4x384xf32>
    tpu.vector_store %arg5[%c12, %c0_9], %16 {strides = array<i32>} : memref<40x384xf32, #tpu.memory_space<vmem>>, vector<4x384xf32>,
    %18 = arith.index_cast %c0_i32 : i32 to index
    %c0_10 = arith.constant 0 : index
    %c19 = arith.constant 19 : index
    %19 = vector.load %arg1[%18, %c0_10, %c19] : memref<1x4x512xf32, #tpu.memory_space<vmem>>, vector<1x4x384xf32>
    %20 = vector.shape_cast %19 : vector<1x4x384xf32> to vector<4x384xf32>
    %c16 = arith.constant 16 : index
    %c0_11 = arith.constant 0 : index
    %21 = vector.load %arg5[%c16, %c0_11] : memref<40x384xf32, #tpu.memory_space<vmem>>, vector<4x384xf32>
    tpu.vector_store %arg5[%c16, %c0_11], %20 {strides = array<i32>} : memref<40x384xf32, #tpu.memory_space<vmem>>, vector<4x384xf32>,
    %22 = arith.index_cast %c0_i32 : i32 to index
    %c0_12 = arith.constant 0 : index
    %c20 = arith.constant 20 : index
    %23 = vector.load %arg1[%22, %c0_12, %c20] : memref<1x4x512xf32, #tpu.memory_space<vmem>>, vector<1x4x384xf32>
    %24 = vector.shape_cast %23 : vector<1x4x384xf32> to vector<4x384xf32>
    %c20_13 = arith.constant 20 : index
    %c0_14 = arith.constant 0 : index
    %25 = vector.load %arg5[%c20_13, %c0_14] : memref<40x384xf32, #tpu.memory_space<vmem>>, vector<4x384xf32>
    tpu.vector_store %arg5[%c20_13, %c0_14], %24 {strides = array<i32>} : memref<40x384xf32, #tpu.memory_space<vmem>>, vector<4x384xf32>,
    %26 = arith.index_cast %c0_i32 : i32 to index
    %c0_15 = arith.constant 0 : index
    %c36_16 = arith.constant 36 : index
    %27 = vector.load %arg1[%26, %c0_15, %c36_16] : memref<1x4x512xf32, #tpu.memory_space<vmem>>, vector<1x4x384xf32>
    %28 = vector.shape_cast %27 : vector<1x4x384xf32> to vector<4x384xf32>
    %c24 = arith.constant 24 : index
    %c0_17 = arith.constant 0 : index
    %29 = vector.load %arg5[%c24, %c0_17] : memref<40x384xf32, #tpu.memory_space<vmem>>, vector<4x384xf32>
    tpu.vector_store %arg5[%c24, %c0_17], %28 {strides = array<i32>} : memref<40x384xf32, #tpu.memory_space<vmem>>, vector<4x384xf32>,
    %30 = arith.index_cast %c0_i32 : i32 to index
    %c0_18 = arith.constant 0 : index
    %c37 = arith.constant 37 : index
    %31 = vector.load %arg1[%30, %c0_18, %c37] : memref<1x4x512xf32, #tpu.memory_space<vmem>>, vector<1x4x384xf32>
    %32 = vector.shape_cast %31 : vector<1x4x384xf32> to vector<4x384xf32>
    %c28 = arith.constant 28 : index
    %c0_19 = arith.constant 0 : index
    %33 = vector.load %arg5[%c28, %c0_19] : memref<40x384xf32, #tpu.memory_space<vmem>>, vector<4x384xf32>
    tpu.vector_store %arg5[%c28, %c0_19], %32 {strides = array<i32>} : memref<40x384xf32, #tpu.memory_space<vmem>>, vector<4x384xf32>,
    %34 = arith.index_cast %c0_i32 : i32 to index
    %c0_20 = arith.constant 0 : index
    %c38 = arith.constant 38 : index
    %35 = vector.load %arg1[%34, %c0_20, %c38] : memref<1x4x512xf32, #tpu.memory_space<vmem>>, vector<1x4x384xf32>
    %36 = vector.shape_cast %35 : vector<1x4x384xf32> to vector<4x384xf32>
    %c32 = arith.constant 32 : index
    %c0_21 = arith.constant 0 : index
    %37 = vector.load %arg5[%c32, %c0_21] : memref<40x384xf32, #tpu.memory_space<vmem>>, vector<4x384xf32>
    tpu.vector_store %arg5[%c32, %c0_21], %36 {strides = array<i32>} : memref<40x384xf32, #tpu.memory_space<vmem>>, vector<4x384xf32>,
    %38 = arith.index_cast %c0_i32 : i32 to index
    %c0_22 = arith.constant 0 : index
    %c0_23 = arith.constant 0 : index
    %39 = vector.load %arg2[%38, %c0_22, %c0_23] : memref<1x8x40xf32, #tpu.memory_space<vmem>>, vector<1x8x40xf32>
    %40 = vector.shape_cast %39 : vector<1x8x40xf32> to vector<8x40xf32>
    %c0_24 = arith.constant 0 : index
    %c0_25 = arith.constant 0 : index
    %41 = vector.load %arg5[%c0_24, %c0_25] : memref<40x384xf32, #tpu.memory_space<vmem>>, vector<40x384xf32>
    %cst_26 = arith.constant dense<0.000000e+00> : vector<8x384xf32>
    %42 = tpu.matmul %40, %41, %cst_26 {dimension_numbers = #tpu.dot_dimension_numbers<[1], [0], [0], [1], [0, 0, 1, 1], [], []>} : vector<8x40xf32>, vector<40x384xf32>, vector<8x384xf32> -> vector<8x384xf32>
    %43 = arith.index_cast %c0_i32 : i32 to index
    %c0_27 = arith.constant 0 : index
    %c0_28 = arith.constant 0 : index
    %44 = vector.load %arg3[%43, %c0_27, %c0_28] : memref<1x8x1xf32, #tpu.memory_space<vmem>>, vector<1x8x1xf32>
    %45 = vector.shape_cast %44 : vector<1x8x1xf32> to vector<8x1xf32>
    %46 = vector.broadcast %45 : vector<8x1xf32> to vector<8x384xf32>
    %47 = arith.addf %42, %46 : vector<8x384xf32>
    %48 = arith.index_cast %c0_i32 : i32 to index
    %c0_29 = arith.constant 0 : index
    %c0_30 = arith.constant 0 : index
    %49 = vector.load %arg4[%48, %c0_29, %c0_30] : memref<1x8x384xf32, #tpu.memory_space<vmem>>, vector<1x8x384xf32>
    %50 = vector.shape_cast %49 : vector<1x8x384xf32> to vector<8x384xf32>
    %51 = vector.shape_cast %47 : vector<8x384xf32> to vector<1x8x384xf32>
    tpu.vector_store %arg4[%48, %c0_29, %c0_30], %51 {strides = array<i32>} : memref<1x8x384xf32, #tpu.memory_space<vmem>>, vector<1x8x384xf32>,
    %c1_i32 = arith.constant 1 : i32
    return
  }
  func.func @transform_0(%arg0: i32) -> (i32, i32, i32) {
    %c0_i32 = arith.constant 0 : i32
    %c0_i32_0 = arith.constant 0 : i32
    %c0_i32_1 = arith.constant 0 : i32
    return %arg0, %c0_i32, %c0_i32_0 : i32, i32, i32
  }
  func.func @transform_1(%arg0: i32) -> (i32, i32, i32) {
    %c0_i32 = arith.constant 0 : i32
    %c0_i32_0 = arith.constant 0 : i32
    %c0_i32_1 = arith.constant 0 : i32
    return %arg0, %c0_i32, %c0_i32_0 : i32, i32, i32
  }
  func.func @transform_2(%arg0: i32) -> (i32, i32, i32) {
    %c0_i32 = arith.constant 0 : i32
    %c0_i32_0 = arith.constant 0 : i32
    %c0_i32_1 = arith.constant 0 : i32
    return %arg0, %c0_i32, %c0_i32_0 : i32, i32, i32
  }
  func.func @transform_3(%arg0: i32) -> (i32, i32, i32) {
    %c0_i32 = arith.constant 0 : i32
    %c0_i32_0 = arith.constant 0 : i32
    %c0_i32_1 = arith.constant 0 : i32
    return %arg0, %c0_i32, %c0_i32_0 : i32, i32, i32
  }
}

</mosaic_0001>

<bundles_post_ra>
// kernel: tpu_custom_call.1
= control target key start
LH: loop header
LB: loop body
LE: loop exit
PB: predicated region body
PF: predicated region fallthrough
CT: control target
= control target key end

     0   :  { %8 = vsyncpa [#allocation4], 0  ;;  %s1076_s0 = inlined_call_operand.hbm [shape: f32[2,4,512], index: 0, kind: input, shape index: {}]   ;;  %s1077_s1 = inlined_call_operand.vmem [shape: f32[2,8,40], index: 1, kind: input, shape index: {}]   ;;  %s1078_s2 = inlined_call_operand.vmem [shape: f32[2,8,1], index: 2, kind: input, shape index: {}]   ;;  %s1079_s3 = inlined_call_operand.hbm [shape: f32[2,8,384], index: 3, kind: output, shape index: {}]  }
   0x1   :  { %10 = vsyncpa [#allocation4 + $0x1], 0 }
   0x2   :  { %11 = vsyncpa [#allocation5], 0 }
   0x3   :  { %13 = vsyncpa [#allocation5 + $0x1], 0  ;;  %s883_s12 = smov 0   ;;  %s885_s13 = smov 0  }
   0x4   :  { %s887_s14 = smov 0   ;;  %s889_s15 = smov 0  }
   0x5 LB: > { %s904_s16 = sadd.s32 4294967295, %s851_s15   ;;  %s678_s17 = sadd.s32 4294967294, %s851_s15   ;;  %s851_s15 = sphi %s889_s15, %s1089_s15   ;;  %s847_s14 = sphi %s887_s14, %s1088_s14   ;;  %s843_s13 = sphi %s885_s13, %s1087_s13   ;;  %s839_s12 = sphi %s883_s12, %s1086_s12  }
   0x6   : > { %s908_s18 = sadd.s32 1, %s851_s15   ;;  %s26_s19 = sadd.s32 1, %s847_s14 }
   0x7   : > { %s23_s20 = ssub.s32 %s851_s15, %s908_s18  ;;  %p33_p0 = scmp.ne.s32.totalorder %s847_s14, %s843_s13 }
   0x8   : > { %p24_p1 = scmp.eq.s32.totalorder %s23_s20, 0  ;;  %p34_p2 = scmp.eq.s32.totalorder %s851_s15, 0 }
   0x9   : > { %p39_p3 = scmp.ne.s32.totalorder %s843_s13, %s839_s12  ;;  %p40_p4 = scmp.eq.s32.totalorder %s904_s16, 0 }
   0xa   : > { %s920_s21 = scalar_select %p24_p1, %s847_s14, %s26_s19  }
   0xb   : > { %p922_p5 = por %p34_p2, %p33_p0  ;;  %p926_p6 = por %p40_p4, %p39_p3 }
   0xc   : > { %p115_p7 = scmp.eq.s32.totalorder %s904_s16, 1  ;;  %p121_p8 = scmp.eq.s32.totalorder %s678_s17, 1 }
   0xd   : > { %p709_p10 = scmp.lt.s32.totalorder %s851_s15, 2  ;;  %s141_s26 = sand.u32 1, %s847_s14  }
   0xe   : > { %p933_p11 = por %p115_p7, %p33_p0  ;;  %p937_p12 = por %p121_p8, %p39_p3 }
   0xf   : > { %s694_s27 = sshll.u32 %s851_s15, 4  ;;  %s681_s28 = sshll.u32 %s141_s26, 4 }
  0x10   : > { %s150_s4 = scalar_lea.hbm %s1076_s0, %s694_s27  ;;  %s145_s6 = scalar_lea.vmem [#allocation3], %s681_s28 }
  0x11   : > { %s152_s5 = sshll.u32 %s150_s4, 4  ;;  %s154_s7 = sshll.u32 %s145_s6, 4  ;;  %s153_s5 = int_to_ptr.hbm [resolvable:$true] %s152_s5  ;;  %s155_s7 = int_to_ptr.vmem [resolvable:$true] %s154_s7 }
  0x12   : > { %p948_p13 = pnand %p709_p10, %p922_p5  ;;  %p684_p0 = scmp.ge.s32.totalorder %s851_s15, 1 }
  0x13   : > { %p173_p1 = scmp.lt.s32.totalorder %s851_s15, 3  ;;  %s142_s9 = scalar_lea.sflag [#allocation4], %s141_s26 }
  0x14   : > { %s755_s10 = sshra.s32 %s153_s5, 4  ;;  %p759_p3 = pneg %p948_p13  ;;  %s756_s10 = int_to_ptr.hbm [resolvable:$true] %s755_s10 }
  0x15   : > { %s757_s11 = scalar_lea.hbm %s756_s10, 16  ;;  %s762_s20 = scalar_lea.hbm %s1076_s0, 32 }
  0x16   : > { %p758_p2 = scmp.ne.s32.totalorder %s756_s10, %s757_s11  ;;  %p763_p5 = scmp.lt.s32.totalorder %s756_s10, %s1076_s0 }
  0x17   : > { %p764_p8 = scmp.lt.s32.totalorder %s762_s20, %s757_s11 }
  0x18   : > { %p760_p4 = pnand %p759_p3, %p758_p2 }
  0x19   : > { %p765_p10 = por %p764_p8, %p763_p5 }
  0x1a   : > { %p761_p7 = pneg %p760_p4 }
  0x1c   : > { %p766_p9 = pnand %p765_p10, %p761_p7 }
  0x1e   : > { %769 = shalt.err (!%p766_p9)
}
  0x1f   : > { %704 = dma.hbm_to_vmem [thread:$0]  (!%p948_p13), %s153_s5, 256, %s155_s7, %s142_s9  }
  0x20   : > { %p174_p2 = pnand %p684_p0, %p173_p1 }
  0x21   : > { %s969_s26 = sand.u32 (!%p174_p2), 1, %s843_s13  }
  0x22   : > { %177 = sbr.rel (%p174_p2) target bundleno = 404 (0x194), region = 32  ;;  %s685_s28 = sshll.u32 (!%p174_p2), %s969_s26, 4 }
  0x23   : > { %s180_s29 = scalar_lea.sflag (!%p174_p2), [#allocation4], %s969_s26  ;;  %s183_s30 = scalar_lea.vmem (!%p174_p2), [#allocation3], %s685_s28 }
  0x27   : > { %830 = dma.done.wait (%p926_p6), %s180_s29, 256  }
  0x28   : > { %832 = vsyncadd (%p926_p6), %s180_s29, 4294967040  ;;  %v227_v0 = vld [vmem:[%s183_s30 + $0x8] sm:$0xf]  ;;  %v977_v1 = vld [vmem:[%s183_s30] sm:$0xff]  ;;  %s853_s23 = smov 127   ;;  %s854_s4 = smov 126  }
  0x29   : > { %232 = vst [vmem:[#allocation1 + $0x10] ss:$2 sm:$0xff] %v227_v0  ;;  %v980_v2 = vld [vmem:[%s183_s30 + $0x8] sm:$0xff]  ;;  %s855_s5 = smov 110   ;;  %s856_s6 = smov 109   ;;  %vm262_vm0 = vcmask 1039360  }
  0x2a   : > { %230 = vst [vmem:[#allocation1] ss:$2 sm:$0xff] %v977_v1  ;;  %s857_s7 = smov 108   ;;  %s858_s8 = smov 91   ;;  %vm291_vm1 = vcmask 1031168   ;;  %vm321_vm2 = vcmask 900096  }
  0x2b   : > { %s859_s9 = smov 92   ;;  %s860_s10 = smov 90   ;;  %vm350_vm3 = vcmask 891904   ;;  %vm439_vm4 = vcmask 744448   ;;  %vm380_vm5 = vcmask 883712   ;;  %vm409_vm6 = vcmask 752640  }
  0x2c   : > { %p215_p6 = scmp.lt.s32.totalorder %s904_s16, 1  ;;  %vm468_vm7 = vcmask 736256   ;;  %vm500_vm8 = vcmask 326656   ;;  %s695_s30 = smul.u32 24, %s969_s26 }
  0x2d   : > { %s805_s20 = scalar_lea.hbm %s1079_s3, 48 }
  0x2e   : > { %s1024_s11 = scalar_select %p215_p6, %s904_s16, 1 }
  0x30   : > { %v235_v3 = vld.sshfl [vmem:[#allocation1 + $0x10] sm:$0xff pattern:$0x75316420]  ;;  %s686_s17 = sshll.u32 %s1024_s11, 3 }
  0x31   : > { %249 = vst [vmem:[#allocation1 + $0x11] ss:$2 sm:$0xff] %v980_v2  ;;  %v233_v4 = vld.sshfl [vmem:[#allocation1] sm:$0xff pattern:$0x75316420]  ;;  %s222_s22 = scalar_lea.vmem %s1078_s2, %s686_s17  ;;  %s218_s29 = scalar_lea.vmem %s1077_s1, %s686_s17 }
  0x32   : > { %241 = vst [vmem:[#allocation2 + $0x50] sm:$0xf] %v235_v3  ;;  %v234_v5 = vld.sshfl [vmem:[#allocation1 + $0x8] sm:$0xff pattern:$0x75316420] }
  0x33   : > { %247 = vst [vmem:[#allocation1 + $0x1] ss:$2 sm:$0xff] %v977_v1 }
  0x34   : > { %239 = vst [vmem:[#allocation2] sm:$0xf] %v233_v4 }
  0x35   : > { %240 = vst [vmem:[#allocation2 + $0x38] sm:$0xf] %v234_v5  ;;  %v861_v5 = vmov 0.0  }
  0x36   : > { %225 = vst [vmem:[#allocation2 + $0x40] sm:$0xf0] %v861_v5 }
  0x37   : > { %223 = vst [vmem:[#allocation2 + $0x18] sm:$0xf0] %v861_v5 }
  0x38   : > { %v252_v6 = vld.sshfl [vmem:[#allocation1 + $0x10] sm:$0xff pattern:$0x75316420]  ;;  %v253_v7 = vld.sshfl [vmem:[#allocation1 + $0x18] sm:$0xff pattern:$0x75316420] }
  0x39   : > { %258 = vrot.lane.b32.xlu1 %v252_v6, %s853_s23  ;;  %260 = vrot.lane.b32.xlu2 %v253_v7, %s853_s23  ;;  %278 = vst [vmem:[#allocation1 + $0x10] ss:$2 sm:$0xff] %v980_v2 }
  0x3a   : > { %v987_v8 = vld.sshfl [vmem:[#allocation1] sm:$0xff pattern:$0x75316420]  ;;  %v989_v9 = vld.sshfl [vmem:[#allocation1 + $0x8] sm:$0xff pattern:$0x75316420] }
  0x3b   : > { %276 = vst [vmem:[#allocation1] ss:$2 sm:$0xff] %v977_v1 }
  0x3c   : > { %224 = vst [vmem:[#allocation2 + $0x60] sm:$0xf0] %v861_v5 }
  0x40   : > { %v281_v10 = vld.sshfl [vmem:[#allocation1 + $0x10] sm:$0xff pattern:$0x75316420]  ;;  %v282_v11 = vld.sshfl [vmem:[#allocation1 + $0x18] sm:$0xff pattern:$0x75316420] }
  0x41   : > { %287 = vrot.lane.b32.xlu1 %v281_v10, %s854_s4  ;;  %289 = vrot.lane.b32.xlu2 %v282_v11, %s854_s4  ;;  %308 = vst [vmem:[#allocation1 + $0x11] ss:$2 sm:$0xff] %v980_v2 }
  0x42   : > { %v280_v12 = vld.sshfl [vmem:[#allocation1 + $0x8] sm:$0xff pattern:$0x75316420]  ;;  %v279_v13 = vld.sshfl [vmem:[#allocation1] sm:$0xff pattern:$0x75316420] }
  0x43   : > { %285 = vrot.lane.b32.xlu0 %v280_v12, %s854_s4  ;;  %306 = vst [vmem:[#allocation1 + $0x1] ss:$2 sm:$0xff] %v977_v1 }
  0x48   : > { %v312_v14 = vld.sshfl [vmem:[#allocation1 + $0x18] sm:$0xff pattern:$0x75316420]  ;;  %v311_v15 = vld.sshfl [vmem:[#allocation1 + $0x10] sm:$0xff pattern:$0x75316420] }
  0x49   : > { %319 = vrot.lane.b32.xlu1 %v312_v14, %s855_s5  ;;  %337 = vst [vmem:[#allocation1 + $0x10] ss:$2 sm:$0xff] %v980_v2  ;;  %283 = vrot.lane.b32.xlu2 %v279_v13, %s854_s4 }
  0x4a   : > { %v309_v16 = vld.sshfl [vmem:[#allocation1] sm:$0xff pattern:$0x75316420]  ;;  %v310_v17 = vld.sshfl [vmem:[#allocation1 + $0x8] sm:$0xff pattern:$0x75316420] }
  0x4b   : > { %317 = vrot.lane.b32.xlu0 %v311_v15, %s855_s5  ;;  %335 = vst [vmem:[#allocation1] ss:$2 sm:$0xff] %v977_v1 }
  0x50   : > { %v341_v18 = vld.sshfl [vmem:[#allocation1 + $0x18] sm:$0xff pattern:$0x75316420]  ;;  %v340_v19 = vld.sshfl [vmem:[#allocation1 + $0x10] sm:$0xff pattern:$0x75316420] }
  0x51   : > { %348 = vrot.lane.b32.xlu1 %v341_v18, %s856_s6  ;;  %367 = vst [vmem:[#allocation1 + $0x11] ss:$2 sm:$0xff] %v980_v2 }
  0x52   : > { %v339_v20 = vld.sshfl [vmem:[#allocation1 + $0x8] sm:$0xff pattern:$0x75316420]  ;;  %v338_v21 = vld.sshfl [vmem:[#allocation1] sm:$0xff pattern:$0x75316420] }
  0x53   : > { %346 = vrot.lane.b32.xlu0 %v340_v19, %s856_s6  ;;  %344 = vrot.lane.b32.xlu2 %v339_v20, %s856_s6  ;;  %365 = vst [vmem:[#allocation1 + $0x1] ss:$2 sm:$0xff] %v977_v1  ;;  %v494_v20 = vld [vmem:[%s222_s22] sm:$0xff] }
  0x58   : > { %v371_v22 = vld.sshfl [vmem:[#allocation1 + $0x18] sm:$0xff pattern:$0x75316420]  ;;  %v370_v23 = vld.sshfl [vmem:[#allocation1 + $0x10] sm:$0xff pattern:$0x75316420] }
  0x59   : > { %342 = vrot.lane.b32.xlu1 %v338_v21, %s856_s6  ;;  %396 = vst [vmem:[#allocation1 + $0x10] ss:$2 sm:$0xff] %v980_v2  ;;  %v862_v21 = vmov 0  }
  0x5a   : > { %v369_v24 = vld.sshfl [vmem:[#allocation1 + $0x8] sm:$0xff pattern:$0x75316420]  ;;  %v368_v25 = vld.sshfl [vmem:[#allocation1] sm:$0xff pattern:$0x75316420]  ;;  %753 = vset.pattern.permute.xlu2 %v862_v21  ;;  %754 = vset.pattern.permute.xlu0 %v862_v21 }
  0x5b   : > { %378 = vrot.lane.b32.xlu0 %v371_v22, %s857_s7  ;;  %376 = vrot.lane.b32.xlu2 %v370_v23, %s857_s7  ;;  %394 = vst [vmem:[#allocation1] ss:$2 sm:$0xff] %v977_v1 }
  0x60   : > { %v399_v26 = vld.sshfl [vmem:[#allocation1 + $0x10] sm:$0xff pattern:$0x75316420]  ;;  %v400_v27 = vld.sshfl [vmem:[#allocation1 + $0x18] sm:$0xff pattern:$0x75316420] }
  0x61   : > { %374 = vrot.lane.b32.xlu1 %v369_v24, %s857_s7  ;;  %426 = vst [vmem:[#allocation1 + $0x11] ss:$2 sm:$0xff] %v980_v2 }
  0x62   : > { %v398_v28 = vld.sshfl [vmem:[#allocation1 + $0x8] sm:$0xff pattern:$0x75316420]  ;;  %v397_v29 = vld.sshfl [vmem:[#allocation1] sm:$0xff pattern:$0x75316420] }
  0x63   : > { %372 = vrot.lane.b32.xlu0 %v368_v25, %s857_s7  ;;  %424 = vst [vmem:[#allocation1 + $0x1] ss:$2 sm:$0xff] %v977_v1  ;;  %s214_s7 = scalar_lea.vmem [#allocation6], %s695_s30 }
  0x68   : > { %v429_v30 = vld.sshfl [vmem:[#allocation1 + $0x10] sm:$0xff pattern:$0x75316420]  ;;  %v430_v31 = vld.sshfl [vmem:[#allocation1 + $0x18] sm:$0xff pattern:$0x75316420] }
  0x69   : > { %435 = vrot.lane.b32.xlu2 %v429_v30, %s858_s8  ;;  %405 = vrot.lane.b32.xlu1 %v399_v26, %s859_s9  ;;  %455 = vst [vmem:[#allocation1 + $0x10] ss:$2 sm:$0xff] %v980_v2 }
  0x6a   : > { %v428_v32 = vld.sshfl [vmem:[#allocation1 + $0x8] sm:$0xff pattern:$0x75316420]  ;;  %v427_v33 = vld.sshfl [vmem:[#allocation1] sm:$0xff pattern:$0x75316420] }
  0x6b   : > { %401 = vrot.lane.b32.xlu0 %v397_v29, %s859_s9  ;;  %453 = vst [vmem:[#allocation1] ss:$2 sm:$0xff] %v977_v1 }
  0x70   : > { %v458_v34 = vld.sshfl [vmem:[#allocation1 + $0x10] sm:$0xff pattern:$0x75316420]  ;;  %v459_v36 = vld.sshfl [vmem:[#allocation1 + $0x18] sm:$0xff pattern:$0x75316420] }
  0x71   : > { %437 = vrot.lane.b32.xlu2 %v430_v31, %s858_s8  ;;  %407 = vrot.lane.b32.xlu1 %v400_v27, %s859_s9 }
  0x72   : > { %v456_v35 = vld.sshfl [vmem:[#allocation1] sm:$0xff pattern:$0x75316420]  ;;  %v457_v37 = vld.sshfl [vmem:[#allocation1 + $0x8] sm:$0xff pattern:$0x75316420] }
  0x73   : > { %433 = vrot.lane.b32.xlu0 %v428_v32, %s858_s8 }
  0x79   : > { %403 = vrot.lane.b32.xlu1 %v398_v28, %s859_s9  ;;  %431 = vrot.lane.b32.xlu2 %v427_v33, %s858_s8  ;;  %s581_s8 = sshll.u32 %s214_s7, 4  ;;  %s582_s8 = int_to_ptr.vmem [resolvable:$true] %s581_s8 }
  0x7b   : > { %464 = vrot.lane.b32.xlu0 %v458_v34, %s860_s10 }
  0x81   : > { %313 = vrot.lane.b32.xlu1 %v309_v16, %s855_s5  ;;  %460 = vrot.lane.b32.xlu2 %v456_v35, %s860_s10 }
  0x83   : > { %466 = vrot.lane.b32.xlu0 %v459_v36, %s860_s10  ;;  %v478_v36 = vld [vmem:[%s218_s29] sm:$0xff] }
  0x89   : > { %256 = vrot.lane.b32.xlu1 %v989_v9, %s853_s23  ;;  %315 = vrot.lane.b32.xlu2 %v310_v17, %s855_s5 }
  0x8b   : > { %462 = vrot.lane.b32.xlu0 %v457_v37, %s860_s10 }
  0x91   : > { %497 = vperm.xlu2 %753, %v494_v20  }
  0x93   : > { %254 = vrot.lane.b32.xlu0 %v987_v8, %s853_s23  ;;  %v261_v38 = vpop.permute.xlu2 %260  ;;  %s696_s23 = smul.u32 24, %s904_s16  ;;  %s568_s16 = scalar_lea.sflag [#allocation5], %s969_s26 }
  0x95   : > { %s579_s6 = scalar_lea.hbm %s1079_s3, %s696_s23 }
  0x96   : > { %s583_s9 = sshll.u32 %s579_s6, 4  ;;  %s584_s9 = int_to_ptr.hbm [resolvable:$true] %s583_s9 }
  0x97   : > { %s799_s10 = sshra.s32 %s584_s9, 4  ;;  %s800_s10 = int_to_ptr.hbm [resolvable:$true] %s799_s10 }
  0x98   : > { %s801_s11 = scalar_lea.hbm %s800_s10, 24  ;;  %p806_p1 = scmp.lt.s32.totalorder %s800_s10, %s1079_s3 }
  0x99   : > { %p802_p9 = scmp.ne.s32.totalorder %s800_s10, %s801_s11  ;;  %p807_p3 = scmp.lt.s32.totalorder %s805_s20, %s801_s11 }
  0x9b   : > { %v290_v39 = vpop.permute.xlu2 %289  ;;  %p803_p13 = pnand %p802_p9, %p933_p11  ;;  %p808_p4 = por %p807_p3, %p806_p1 }
  0x9d   : > { %p804_p0 = pneg %p803_p13 }
  0x9f   : > { %p809_p7 = pnand %p808_p4, %p804_p0 }
  0xa3   : > { %v284_v40 = vpop.permute.xlu2 %283 }
  0xab   : > { %v1012_v41 = vpop.permute.xlu1 %258 }
  0xac   : > { %v265_v42 = vsel %vm262_vm0, %v1012_v41, %v261_v38 }
  0xad   : > { %271 = vst [vmem:[#allocation2 + $0x50] sm:$0xf0] %v265_v42  ;;  %v345_v43 = vpop.permute.xlu2 %344 }
  0xb3   : > { %v288_v44 = vpop.permute.xlu1 %287 }
  0xb4   : > { %v294_v45 = vsel %vm291_vm1, %v288_v44, %v290_v39  ;;  %v481_v39 = vld [vmem:[#allocation2 + $0x50] sm:$0xff] }
  0xb5   : > { %300 = vst [vmem:[#allocation2 + $0x28] sm:$0xf] %v294_v45  ;;  %v286_v46 = vpop.permute.xlu0 %285  ;;  %v377_v49 = vpop.permute.xlu2 %376 }
  0xb6   : > { %v292_v47 = vsel %vm291_vm1, %v284_v40, %v286_v46  ;;  %v293_v48 = vsel %vm291_vm1, %v286_v46, %v288_v44 }
  0xb7   : > { %298 = vst [vmem:[#allocation2 + $0x68] sm:$0xf] %v292_v47 }
  0xb8   : > { %299 = vst [vmem:[#allocation2 + $0x30] sm:$0xf] %v293_v48 }
  0xbb   : > { %v320_v50 = vpop.permute.xlu1 %319 }
  0xbd   : > { %v318_v51 = vpop.permute.xlu0 %317 }
  0xbe   : > { %v324_v52 = vsel %vm321_vm2, %v318_v51, %v320_v50 }
  0xbf   : > { %330 = vst [vmem:[#allocation2 + $0x28] sm:$0xf0] %v324_v52 }
  0xc3   : > { %v349_v53 = vpop.permute.xlu1 %348  ;;  %v436_v54 = vpop.permute.xlu2 %435 }
  0xc5   : > { %v347_v55 = vpop.permute.xlu0 %346 }
  0xc6   : > { %v352_v56 = vsel %vm350_vm3, %v345_v43, %v347_v55  ;;  %v353_v57 = vsel %vm350_vm3, %v347_v55, %v349_v53  ;;  %v484_v34 = vld [vmem:[#allocation2 + $0x28] sm:$0xff] }
  0xc7   : > { %358 = vst [vmem:[#allocation2 + $0x70] sm:$0xf] %v352_v56 }
  0xc8   : > { %359 = vst [vmem:[#allocation2 + $0x20] sm:$0xf] %v353_v57 }
  0xcb   : > { %v438_v58 = vpop.permute.xlu2 %437  ;;  %v343_v59 = vpop.permute.xlu1 %342 }
  0xcc   : > { %v442_v60 = vsel %vm439_vm4, %v436_v54, %v438_v58  ;;  %v351_v61 = vsel %vm350_vm3, %v343_v59, %v345_v43 }
  0xcd   : > { %v379_v62 = vpop.permute.xlu0 %378  ;;  %448 = vst [vmem:[#allocation2 + $0x10] sm:$0xf0] %v442_v60 }
  0xce   : > { %v383_v63 = vsel %vm380_vm5, %v377_v49, %v379_v62  ;;  %357 = vst [vmem:[#allocation2 + $0x8] sm:$0xf] %v351_v61 }
  0xcf   : > { %389 = vst [vmem:[#allocation2 + $0x20] sm:$0xf0] %v383_v63 }
  0xd3   : > { %v375_v0 = vpop.permute.xlu1 %374  ;;  %v432_v1 = vpop.permute.xlu2 %431 }
  0xd4   : > { %v382_v2 = vsel %vm380_vm5, %v375_v0, %v377_v49 }
  0xd5   : > { %388 = vst [vmem:[#allocation2 + $0x70] sm:$0xf0] %v382_v2  ;;  %v373_v3 = vpop.permute.xlu0 %372 }
  0xd6   : > { %v381_v4 = vsel %vm380_vm5, %v373_v3, %v375_v0  ;;  %v487_v33 = vld [vmem:[#allocation2 + $0x20] sm:$0xff] }
  0xd7   : > { %387 = vst [vmem:[#allocation2 + $0x8] sm:$0xf0] %v381_v4 }
  0xdb   : > { %v406_v6 = vpop.permute.xlu1 %405  ;;  %v461_v7 = vpop.permute.xlu2 %460 }
  0xdc   : > { %v486_v44 = vld [vmem:[#allocation2 + $0x70] sm:$0xff] }
  0xdd   : > { %v402_v8 = vpop.permute.xlu0 %401 }
  0xde   : > { %v485_v43 = vld [vmem:[#allocation2 + $0x8] sm:$0xff] }
  0xe3   : > { %v408_v9 = vpop.permute.xlu1 %407  ;;  %v316_v10 = vpop.permute.xlu2 %315 }
  0xe4   : > { %v412_v11 = vsel %vm409_vm6, %v406_v6, %v408_v9  ;;  %v323_v12 = vsel %vm321_vm2, %v316_v10, %v318_v51 }
  0xe5   : > { %418 = vst [vmem:[#allocation2 + $0x10] sm:$0xf] %v412_v11  ;;  %v434_v13 = vpop.permute.xlu0 %433 }
  0xe6   : > { %v440_v14 = vsel %vm439_vm4, %v432_v1, %v434_v13  ;;  %v441_v15 = vsel %vm439_vm4, %v434_v13, %v436_v54  ;;  %329 = vst [vmem:[#allocation2 + $0x30] sm:$0xf0] %v323_v12 }
  0xe7   : > { %446 = vst [vmem:[#allocation2 + $0x48] sm:$0xf0] %v440_v14 }
  0xe8   : > { %447 = vst [vmem:[#allocation2 + $0x58] sm:$0xf0] %v441_v15 }
  0xeb   : > { %v404_v16 = vpop.permute.xlu1 %403  ;;  %v498_v49 = vpop.permute.xlu2 %497 }
  0xec   : > { %v410_v17 = vsel %vm409_vm6, %v402_v8, %v404_v16  ;;  %v411_v18 = vsel %vm409_vm6, %v404_v16, %v406_v6  ;;  %v490_v32 = vld [vmem:[#allocation2 + $0x10] sm:$0xff] }
  0xed   : > { %416 = vst [vmem:[#allocation2 + $0x48] sm:$0xf] %v410_v17  ;;  %v465_v19 = vpop.permute.xlu0 %464  ;;  %v483_v46 = vld [vmem:[#allocation2 + $0x30] sm:$0xff] }
  0xee   : > { %417 = vst [vmem:[#allocation2 + $0x58] sm:$0xf] %v411_v18 }
  0xf3   : > { %v314_v22 = vpop.permute.xlu1 %313 }
  0xf4   : > { %v322_v23 = vsel %vm321_vm2, %v314_v22, %v316_v10 }
  0xf5   : > { %328 = vst [vmem:[#allocation2 + $0x68] sm:$0xf0] %v322_v23  ;;  %v467_v24 = vpop.permute.xlu0 %466  ;;  %v489_v42 = vld [vmem:[#allocation2 + $0x58] sm:$0xff] }
  0xf6   : > { %v471_v25 = vsel %vm468_vm7, %v465_v19, %v467_v24 }
  0xf7   : > { %477 = vst [vmem:[#allocation2 + $0x40] sm:$0xf] %v471_v25 }
  0xfb   : > { %v257_v26 = vpop.permute.xlu1 %256 }
  0xfc   : > { %v264_v27 = vsel %vm262_vm0, %v257_v26, %v1012_v41  ;;  %v488_v41 = vld [vmem:[#allocation2 + $0x48] sm:$0xff] }
  0xfd   : > { %270 = vst [vmem:[#allocation2 + $0x38] sm:$0xf0] %v264_v27  ;;  %v463_v28 = vpop.permute.xlu0 %462  ;;  %v482_v45 = vld [vmem:[#allocation2 + $0x68] sm:$0xff] }
  0xfe   : > { %v469_v29 = vsel %vm468_vm7, %v461_v7, %v463_v28  ;;  %v470_v30 = vsel %vm468_vm7, %v463_v28, %v465_v19  ;;  %v493_v31 = vld [vmem:[#allocation2 + $0x40] sm:$0xff] }
  0xff   : > { %475 = vst [vmem:[#allocation2 + $0x18] sm:$0xf] %v469_v29  ;;  %555 = vmatpush.msra.mxu2 %v493_v31 }
 0x100   : > { %476 = vst [vmem:[#allocation2 + $0x60] sm:$0xf] %v470_v30 }
 0x101   : > { %556 = vmatpush.msra.mxu2 %v490_v32 }
 0x103   : > { %557 = vmatpush.msra.mxu2 %v487_v33 }
 0x104   : > { %v480_v48 = vld [vmem:[#allocation2 + $0x38] sm:$0xff] }
 0x105   : > { %v255_v35 = vpop.permute.xlu0 %254  ;;  %558 = vmatpush.msra.mxu2 %v484_v34 }
 0x106   : > { %v263_v37 = vsel %vm262_vm0, %v255_v35, %v257_v26  ;;  %v491_v38 = vld [vmem:[#allocation2 + $0x18] sm:$0xff] }
 0x107   : > { %269 = vst [vmem:[#allocation2] sm:$0xf0] %v263_v37  ;;  %515 = vmatpush.msra.mxu0 %v491_v38  ;;  %v492_v40 = vld [vmem:[#allocation2 + $0x60] sm:$0xff]  ;;  %559 = vmatpush.msra.mxu2 %v481_v39 }
 0x108   : > { %535 = vmatpush.msra.mxu1 %v492_v40  ;;  %690 = vmatmul.msk.f32.vlgmr.msra.gmra.mxu2 %vm500_vm8, %v478_v36 }
 0x109   : > { %516 = vmatpush.msra.mxu0 %v488_v41 }
 0x10a   : > { %536 = vmatpush.msra.mxu1 %v489_v42 }
 0x10b   : > { %517 = vmatpush.msra.mxu0 %v485_v43 }
 0x10c   : > { %537 = vmatpush.msra.mxu1 %v486_v44 }
 0x10d   : > { %518 = vmatpush.msra.mxu0 %v482_v45 }
 0x10e   : > { %538 = vmatpush.msra.mxu1 %v483_v46  ;;  %v479_v47 = vld [vmem:[#allocation2] sm:$0xff] }
 0x10f   : > { %519 = vmatpush.msra.mxu0 %v479_v47 }
 0x110   : > { %539 = vmatpush.msra.mxu1 %v480_v48  ;;  %688 = vmatmul.msk.f32.vlgmr.msra.gmra.mxu0 %vm500_vm8, %v478_v36 }
 0x111   : > { %689 = vmatmul.msk.f32.vlgmr.msra.gmra.mxu1 %vm500_vm8, %v478_v36 }
 0x18b   : > { %v561_v50 = vpop.f32.mrf.mxu2 }
 0x18c   : > { %v562_v51 = vadd.f32 %v561_v50, %v498_v49 }
 0x18d   : > { %v521_v52 = vpop.f32.mrf.mxu0 }
 0x18e   : > { %v522_v53 = vadd.f32 %v521_v52, %v498_v49  ;;  %v541_v54 = vpop.f32.mrf.mxu1  ;;  %566 = vst [vmem:[%s214_s7 + $0x10] sm:$0xff] %v562_v51 }
 0x18f   : > { %v542_v55 = vadd.f32 %v541_v54, %v498_v49 }
 0x190   : > { %564 = vst [vmem:[%s214_s7] sm:$0xff] %v522_v53 }
 0x191   : > { %565 = vst [vmem:[%s214_s7 + $0x8] sm:$0xff] %v542_v55 }
 0x192   : > { %812 = shalt.err (!%p809_p7)
}
 0x193   : > { %699 = dma.vmem_to_hbm [thread:$0]  (%p933_p11), %s582_s8, 384, %s584_s9, %s568_s16  }
 0x194 PF: > { %s595_s26 = sand.u32 1, %s839_s12   ;;  %p1085_p5 = scmp.ge.s32.totalorder %s851_s15, 2 }
 0x195   : > { %s596_s28 = scalar_lea.sflag [#allocation5], %s595_s26 }
 0x196   : > { %p706_p8 = pnand %p1085_p5, %p937_p12 }
 0x198   : > { %p707_p10 = pneg %p706_p8 }
 0x19a   : > { %834 = dma.done.wait (%p707_p10), %s596_s28, 384  }
 0x19b   : > { %836 = vsyncadd (%p707_p10), %s596_s28, 4294966912  ;;  %p16_p2 = scmp.ge.s32.totalorder %s908_s18, 4   ;;  %s1086_s12 = smov %s843_s13 }
 0x19c   : > { %s1087_s13 = smov %s847_s14  ;;  %s1088_s14 = smov %s920_s21 }
 0x19d   : > { %s1089_s15 = smov %s908_s18  ;;  %18 = sbr.rel (!%p16_p2) target bundleno = 5 (0x5), region = 96 }
 0x1a2   :  { %602 = vsyncpa [#allocation4], 1 }
 0x1a3   :  { %604 = vsyncpa [#allocation4 + $0x1], 1 }
 0x1a4   :  { %605 = vsyncpa [#allocation5], 1 }
 0x1a5   :  { %607 = vsyncpa [#allocation5 + $0x1], 1 }

</bundles_post_ra>
